<compile_context>
chip_gen: v6e
topology: v6e:2x2x1
jax: 0.10.0
libtpu: 0.0.40
codegen_flags: <defaults>
</compile_context>

<pallas_src>
import functools

import jax
import jax.numpy as jnp
from jax import lax
from jax.experimental import pallas as pl
from jax.experimental.pallas import tpu as pltpu


def _round_up(x, m):
    return ((x + m - 1) // m) * m


# ---------------------------------------------------------------------------
# Pallas kernel: im2col patch in VMEM + one merged-K matmul + bias + ReLU
# ---------------------------------------------------------------------------
def _conv_block_kernel(x_ref, w_ref, b_ref, o_ref, patch_ref, *,
                       kh, kw, cin, wp, tm):
    # x_ref:     (1, 1, TM_IN, Cin)  row tile of flattened padded image + halo
    # w_ref:     (KH*KW*Cin, Cout)   merged-K weight
    # b_ref:     (1, Cout)           bias (f32)
    # o_ref:     (1, TM, Cout)       stride-1 extended output rows (:Cout only)
    # patch_ref: (TM, KH*KW*Cin)     VMEM scratch, compute dtype
    #
    # Build the im2col patch entirely in VMEM: KH*KW contiguous row-slice
    # copies (no HBM traffic).  Column block t*Cin:(t+1)*Cin holds tap
    # (di, dj) with t = di*KW + dj.
    for di in range(kh):                               # unrolled at trace time
        for dj in range(kw):
            t = di * kw + dj
            off = di * wp + dj                         # static Python int
            patch_ref[:, t * cin:(t + 1) * cin] = x_ref[0, 0, off:off + tm, :]

    # Single MXU contraction over K = KH*KW*Cin (one RHS weight push per tile
    # instead of KH*KW shallow K=Cin dots); f32 accumulation.
    acc = jnp.dot(patch_ref[...], w_ref[...],
                  preferred_element_type=jnp.float32)
    acc = acc + b_ref[...]                             # broadcast (1, Cout)
    o_ref[0] = jnp.maximum(acc, 0.0).astype(o_ref.dtype)   # ReLU epilogue


@functools.partial(
    jax.jit,
    static_argnames=("stride", "padding", "compute_dtype", "out_dtype",
                     "tile_m"))
def conv_block_forward(x, weight, bias, *, stride=1, padding=0,
                       compute_dtype=jnp.float32, out_dtype=jnp.float32,
                       tile_m=512):
    """ConvBlock forward: Conv2d(stride, padding, bias=True) + ReLU.

    x:      (N, Cin, H, W)      NCHW (PyTorch convention)
    weight: (Cout, Cin, KH, KW)
    bias:   (Cout,)
    compute_dtype: MXU input dtype.  bf16 is fine on v5e/v6e/v7x (all have
                   bf16-native MXUs); accumulation stays f32.
    tile_m: extended-output rows per grid step (rounded to a multiple of 8).
            For large images pick tile_m >= ~8*W so the row halo stays cheap.
    returns (N, Cout, OH, OW) in out_dtype.
    """
    n, cin, h, w = x.shape
    cout, _, kh, kw = weight.shape

    hp = h + 2 * padding
    wp = w + 2 * padding
    oh = (hp - kh) // stride + 1
    ow = (wp - kw) // stride + 1
    oh1 = hp - kh + 1                  # stride-1 ("extended") output height
    m_ext = oh1 * wp                   # extended output rows per image
    ktc = kh * kw * cin                # merged contraction depth

    # ---- row tiling over extended output rows -----------------------------
    tm = max(8, _round_up(min(tile_m, m_ext), 8))
    n_tiles = -(-m_ext // tm)
    m_pad = n_tiles * tm
    halo = (kh - 1) * wp + (kw - 1)
    halo_pad = _round_up(halo, 8) if halo else 0
    tm_in = tm + halo_pad

    # ---- input: NCHW -> flattened padded rows -> overlapping row tiles ----
    # One fused XLA pass over the small input (transpose + pad + gather); the
    # halo duplication is halo_pad/tm (small for reasonable tile_m).
    x_nhwc = jnp.transpose(x, (0, 2, 3, 1))
    xp = jnp.pad(x_nhwc, ((0, 0), (padding, padding),
                          (padding, padding), (0, 0)))
    x_flat = xp.reshape(n, hp * wp, cin)
    r_total = m_pad + halo_pad
    x_flat = jnp.pad(x_flat, ((0, 0), (0, r_total - hp * wp), (0, 0)))
    row_idx = (jnp.arange(n_tiles)[:, None] * tm
               + jnp.arange(tm_in)[None, :])           # (n_tiles, TM_IN)
    x_tiles = x_flat[:, row_idx, :].astype(compute_dtype)  # (N, nT, TM_IN, Cin)

    # ---- weight (Cout,Cin,KH,KW) -> (KH*KW*Cin, Cout); bias -> (1, Cout) --
    w_merged = jnp.transpose(weight, (2, 3, 1, 0)).reshape(ktc, cout)
    w_merged = w_merged.astype(compute_dtype)
    b2 = bias.reshape(1, cout).astype(jnp.float32)

    kernel = functools.partial(_conv_block_kernel,
                               kh=kh, kw=kw, cin=cin, wp=wp, tm=tm)

    # ---- VMEM budget (account for 128-lane padding of narrow minor dims) --
    dsz = jnp.dtype(compute_dtype).itemsize
    osz = jnp.dtype(out_dtype).itemsize

    def _lanes(c):
        return _round_up(c, 128)

    vmem_est = (2 * tm_in * _lanes(cin) * dsz          # input blocks (x2 buf)
                + 2 * tm * _lanes(cout) * osz          # output blocks (x2 buf)
                + tm * _lanes(ktc) * dsz               # patch scratch
                + 2 * _round_up(ktc, 8) * _lanes(cout) * dsz   # weight
                + 2 * 8 * _lanes(cout) * 4)            # bias
    vmem_limit = int(min(max(2 * vmem_est, 16 * 2**20), 64 * 2**20))

    cost = pl.CostEstimate(
        flops=2 * n * n_tiles * tm * ktc * cout,
        transcendentals=0,
        bytes_accessed=int(x_tiles.size * dsz + w_merged.size * dsz
                           + n * m_pad * cout * osz))

    out_ext = pl.pallas_call(
        kernel,
        out_shape=jax.ShapeDtypeStruct((n, m_pad, cout), out_dtype),
        grid_spec=pltpu.PrefetchScalarGridSpec(
            num_scalar_prefetch=0,
            grid=(n, n_tiles),
            in_specs=[
                pl.BlockSpec((1, 1, tm_in, cin), lambda b, m: (b, m, 0, 0)),
                pl.BlockSpec((ktc, cout), lambda b, m: (0, 0)),
                pl.BlockSpec((1, cout), lambda b, m: (0, 0)),
            ],
            out_specs=pl.BlockSpec((1, tm, cout), lambda b, m: (b, m, 0)),
            scratch_shapes=[pltpu.VMEM((tm, ktc), compute_dtype)],
        ),
        compiler_params=pltpu.CompilerParams(
            dimension_semantics=("parallel", "parallel"),
            vmem_limit_bytes=vmem_limit),
        cost_estimate=cost,
    )(x_tiles, w_merged, b2)

    # ---- epilogue: drop padded rows / junk wrap-around cols, apply stride --
    out_ext = out_ext[:, :m_ext, :].reshape(n, oh1, wp, cout)
    y_nhwc = out_ext[:, 0:(oh - 1) * stride + 1:stride,
                     0:(ow - 1) * stride + 1:stride, :]
    # TODO(synk): return NHWC when the consumer allows, skipping this transpose.
    return jnp.transpose(y_nhwc, (0, 3, 1, 2)).astype(out_dtype)


if __name__ == "__main__":
    # ConvBlock(inc=4, outc=8, kernel_size=3, padding=1, stride=1,
    #           use_bias=True, activation=nn.ReLU, batch_norm=False)
    key = jax.random.PRNGKey(0)
    k_x, k_w, k_b = jax.random.split(key, 3)

    N, Cin, H, W = 2, 4, 16, 16
    Cout, KH, KW = 8, 3, 3
    padding, stride = 1, 1

    x = jax.random.normal(k_x, (N, Cin, H, W), dtype=jnp.float32)
    fan_in = Cin * KH * KW
    weight = jax.random.normal(k_w, (Cout, Cin, KH, KW),
                               dtype=jnp.float32) / jnp.sqrt(fan_in)
    bias = jax.random.normal(k_b, (Cout,), dtype=jnp.float32) * 0.1

    # Pure-JAX reference (XLA conv).
    ref = lax.conv_general_dilated(
        x, weight, window_strides=(stride, stride),
        padding=[(padding, padding), (padding, padding)],
        dimension_numbers=("NCHW", "OIHW", "NCHW"))
    ref = jnp.maximum(ref + bias.reshape(1, Cout, 1, 1), 0.0)

    # f32 path; tile_m=128 forces multiple row tiles so the halo-tiling path
    # is exercised (grid = (2 batches, 3 row tiles)).
    y = conv_block_forward(x, weight, bias, stride=stride, padding=padding,
                           tile_m=128)
    y = jax.block_until_ready(y)
    assert y.shape == (N, Cout, H, W)
    assert jnp.allclose(y, ref, atol=1e-4, rtol=1e-4)

    # bf16 fast path (valid on v5e/v6e/v7x), looser tolerance.
    y_bf16 = conv_block_forward(x, weight, bias, stride=stride,
                                padding=padding,
                                compute_dtype=jnp.bfloat16, tile_m=128)
    y_bf16 = jax.block_until_ready(y_bf16)
    assert float(jnp.max(jnp.abs(y_bf16 - ref))) < 0.25

    print("KERNEL_OK")
</pallas_src>

<mosaic_0001>
module attributes {stable_mosaic.version = 11 : i64} {
  func.func @_conv_block_kernel(%arg0: i32, %arg1: i32, %arg2: memref<1x1x168x4xf32, #tpu.memory_space<vmem>>, %arg3: memref<36x8xf32, #tpu.memory_space<vmem>>, %arg4: memref<1x8xf32, #tpu.memory_space<vmem>>, %arg5: memref<1x128x8xf32, #tpu.memory_space<vmem>>, %arg6: memref<128x36xf32, #tpu.memory_space<vmem>>) attributes {dimension_semantics = [#tpu.dimension_semantics<parallel>, #tpu.dimension_semantics<parallel>], iteration_bounds = array<i64: 2, 3>, scalar_prefetch = 0 : i64, scratch_operands = 1 : i64, tpu.core_type = #tpu.core_type<tc>, window_params = [{transform_indices = @transform_0, window_bounds = array<i64: 1, 1, 168, 4>}, {pipeline_mode = #tpu.pipeline_mode<synchronous>, transform_indices = @transform_1, window_bounds = array<i64: 36, 8>}, {pipeline_mode = #tpu.pipeline_mode<synchronous>, transform_indices = @transform_2, window_bounds = array<i64: 1, 8>}, {transform_indices = @transform_3, window_bounds = array<i64: 1, 128, 8>}]} {
    %c0 = arith.constant 0 : index
    %c0_0 = arith.constant 0 : index
    %c0_1 = arith.constant 0 : index
    %c0_2 = arith.constant 0 : index
    %0 = vector.load %arg2[%c0, %c0_0, %c0_1, %c0_2] : memref<1x1x168x4xf32, #tpu.memory_space<vmem>>, vector<1x1x128x4xf32>
    %1 = vector.shape_cast %0 : vector<1x1x128x4xf32> to vector<128x4xf32>
    %c0_3 = arith.constant 0 : index
    %c0_4 = arith.constant 0 : index
    %2 = vector.load %arg6[%c0_3, %c0_4] : memref<128x36xf32, #tpu.memory_space<vmem>>, vector<128x4xf32>
    tpu.vector_store %arg6[%c0_3, %c0_4], %1 {strides = array<i32>} : memref<128x36xf32, #tpu.memory_space<vmem>>, vector<128x4xf32>,
    %c0_5 = arith.constant 0 : index
    %c0_6 = arith.constant 0 : index
    %c1 = arith.constant 1 : index
    %c0_7 = arith.constant 0 : index
    %3 = vector.load %arg2[%c0_5, %c0_6, %c1, %c0_7] : memref<1x1x168x4xf32, #tpu.memory_space<vmem>>, vector<1x1x128x4xf32>
    %4 = vector.shape_cast %3 : vector<1x1x128x4xf32> to vector<128x4xf32>
    %c0_8 = arith.constant 0 : index
    %c4 = arith.constant 4 : index
    %5 = vector.load %arg6[%c0_8, %c4] : memref<128x36xf32, #tpu.memory_space<vmem>>, vector<128x4xf32>
    tpu.vector_store %arg6[%c0_8, %c4], %4 {strides = array<i32>} : memref<128x36xf32, #tpu.memory_space<vmem>>, vector<128x4xf32>,
    %c0_9 = arith.constant 0 : index
    %c0_10 = arith.constant 0 : index
    %c2 = arith.constant 2 : index
    %c0_11 = arith.constant 0 : index
    %6 = vector.load %arg2[%c0_9, %c0_10, %c2, %c0_11] : memref<1x1x168x4xf32, #tpu.memory_space<vmem>>, vector<1x1x128x4xf32>
    %7 = vector.shape_cast %6 : vector<1x1x128x4xf32> to vector<128x4xf32>
    %c0_12 = arith.constant 0 : index
    %c8 = arith.constant 8 : index
    %8 = vector.load %arg6[%c0_12, %c8] : memref<128x36xf32, #tpu.memory_space<vmem>>, vector<128x4xf32>
    tpu.vector_store %arg6[%c0_12, %c8], %7 {strides = array<i32>} : memref<128x36xf32, #tpu.memory_space<vmem>>, vector<128x4xf32>,
    %c0_13 = arith.constant 0 : index
    %c0_14 = arith.constant 0 : index
    %c18 = arith.constant 18 : index
    %c0_15 = arith.constant 0 : index
    %9 = vector.load %arg2[%c0_13, %c0_14, %c18, %c0_15] : memref<1x1x168x4xf32, #tpu.memory_space<vmem>>, vector<1x1x128x4xf32>
    %10 = vector.shape_cast %9 : vector<1x1x128x4xf32> to vector<128x4xf32>
    %c0_16 = arith.constant 0 : index
    %c12 = arith.constant 12 : index
    %11 = vector.load %arg6[%c0_16, %c12] : memref<128x36xf32, #tpu.memory_space<vmem>>, vector<128x4xf32>
    tpu.vector_store %arg6[%c0_16, %c12], %10 {strides = array<i32>} : memref<128x36xf32, #tpu.memory_space<vmem>>, vector<128x4xf32>,
    %c0_17 = arith.constant 0 : index
    %c0_18 = arith.constant 0 : index
    %c19 = arith.constant 19 : index
    %c0_19 = arith.constant 0 : index
    %12 = vector.load %arg2[%c0_17, %c0_18, %c19, %c0_19] : memref<1x1x168x4xf32, #tpu.memory_space<vmem>>, vector<1x1x128x4xf32>
    %13 = vector.shape_cast %12 : vector<1x1x128x4xf32> to vector<128x4xf32>
    %c0_20 = arith.constant 0 : index
    %c16 = arith.constant 16 : index
    %14 = vector.load %arg6[%c0_20, %c16] : memref<128x36xf32, #tpu.memory_space<vmem>>, vector<128x4xf32>
    tpu.vector_store %arg6[%c0_20, %c16], %13 {strides = array<i32>} : memref<128x36xf32, #tpu.memory_space<vmem>>, vector<128x4xf32>,
    %c0_21 = arith.constant 0 : index
    %c0_22 = arith.constant 0 : index
    %c20 = arith.constant 20 : index
    %c0_23 = arith.constant 0 : index
    %15 = vector.load %arg2[%c0_21, %c0_22, %c20, %c0_23] : memref<1x1x168x4xf32, #tpu.memory_space<vmem>>, vector<1x1x128x4xf32>
    %16 = vector.shape_cast %15 : vector<1x1x128x4xf32> to vector<128x4xf32>
    %c0_24 = arith.constant 0 : index
    %c20_25 = arith.constant 20 : index
    %17 = vector.load %arg6[%c0_24, %c20_25] : memref<128x36xf32, #tpu.memory_space<vmem>>, vector<128x4xf32>
    tpu.vector_store %arg6[%c0_24, %c20_25], %16 {strides = array<i32>} : memref<128x36xf32, #tpu.memory_space<vmem>>, vector<128x4xf32>,
    %c0_26 = arith.constant 0 : index
    %c0_27 = arith.constant 0 : index
    %c36 = arith.constant 36 : index
    %c0_28 = arith.constant 0 : index
    %18 = vector.load %arg2[%c0_26, %c0_27, %c36, %c0_28] : memref<1x1x168x4xf32, #tpu.memory_space<vmem>>, vector<1x1x128x4xf32>
    %19 = vector.shape_cast %18 : vector<1x1x128x4xf32> to vector<128x4xf32>
    %c0_29 = arith.constant 0 : index
    %c24 = arith.constant 24 : index
    %20 = vector.load %arg6[%c0_29, %c24] : memref<128x36xf32, #tpu.memory_space<vmem>>, vector<128x4xf32>
    tpu.vector_store %arg6[%c0_29, %c24], %19 {strides = array<i32>} : memref<128x36xf32, #tpu.memory_space<vmem>>, vector<128x4xf32>,
    %c0_30 = arith.constant 0 : index
    %c0_31 = arith.constant 0 : index
    %c37 = arith.constant 37 : index
    %c0_32 = arith.constant 0 : index
    %21 = vector.load %arg2[%c0_30, %c0_31, %c37, %c0_32] : memref<1x1x168x4xf32, #tpu.memory_space<vmem>>, vector<1x1x128x4xf32>
    %22 = vector.shape_cast %21 : vector<1x1x128x4xf32> to vector<128x4xf32>
    %c0_33 = arith.constant 0 : index
    %c28 = arith.constant 28 : index
    %23 = vector.load %arg6[%c0_33, %c28] : memref<128x36xf32, #tpu.memory_space<vmem>>, vector<128x4xf32>
    tpu.vector_store %arg6[%c0_33, %c28], %22 {strides = array<i32>} : memref<128x36xf32, #tpu.memory_space<vmem>>, vector<128x4xf32>,
    %c0_34 = arith.constant 0 : index
    %c0_35 = arith.constant 0 : index
    %c38 = arith.constant 38 : index
    %c0_36 = arith.constant 0 : index
    %24 = vector.load %arg2[%c0_34, %c0_35, %c38, %c0_36] : memref<1x1x168x4xf32, #tpu.memory_space<vmem>>, vector<1x1x128x4xf32>
    %25 = vector.shape_cast %24 : vector<1x1x128x4xf32> to vector<128x4xf32>
    %c0_37 = arith.constant 0 : index
    %c32 = arith.constant 32 : index
    %26 = vector.load %arg6[%c0_37, %c32] : memref<128x36xf32, #tpu.memory_space<vmem>>, vector<128x4xf32>
    tpu.vector_store %arg6[%c0_37, %c32], %25 {strides = array<i32>} : memref<128x36xf32, #tpu.memory_space<vmem>>, vector<128x4xf32>,
    %c0_38 = arith.constant 0 : index
    %c0_39 = arith.constant 0 : index
    %27 = vector.load %arg6[%c0_38, %c0_39] : memref<128x36xf32, #tpu.memory_space<vmem>>, vector<128x36xf32>
    %c0_40 = arith.constant 0 : index
    %c0_41 = arith.constant 0 : index
    %28 = vector.load %arg3[%c0_40, %c0_41] : memref<36x8xf32, #tpu.memory_space<vmem>>, vector<36x8xf32>
    %cst = arith.constant dense<0.000000e+00> : vector<128x8xf32>
    %29 = tpu.matmul %27, %28, %cst {dimension_numbers = #tpu.dot_dimension_numbers<[1], [0], [0], [1], [0, 0, 1, 1], [], []>} : vector<128x36xf32>, vector<36x8xf32>, vector<128x8xf32> -> vector<128x8xf32>
    %c0_42 = arith.constant 0 : index
    %c0_43 = arith.constant 0 : index
    %30 = vector.load %arg4[%c0_42, %c0_43] : memref<1x8xf32, #tpu.memory_space<vmem>>, vector<1x8xf32>
    %31 = vector.broadcast %30 : vector<1x8xf32> to vector<128x8xf32>
    %32 = arith.addf %29, %31 : vector<128x8xf32>
    %cst_44 = arith.constant 0.000000e+00 : f32
    %33 = vector.broadcast %cst_44 : f32 to vector<128x8xf32>
    %34 = arith.maximumf %32, %33 : vector<128x8xf32>
    %c0_45 = arith.constant 0 : index
    %c0_46 = arith.constant 0 : index
    %c0_47 = arith.constant 0 : index
    %35 = vector.load %arg5[%c0_45, %c0_46, %c0_47] : memref<1x128x8xf32, #tpu.memory_space<vmem>>, vector<1x128x8xf32>
    %36 = vector.shape_cast %35 : vector<1x128x8xf32> to vector<128x8xf32>
    %37 = vector.shape_cast %34 : vector<128x8xf32> to vector<1x128x8xf32>
    tpu.vector_store %arg5[%c0_45, %c0_46, %c0_47], %37 {strides = array<i32>} : memref<1x128x8xf32, #tpu.memory_space<vmem>>, vector<1x128x8xf32>,
    return
  }
  func.func @transform_0(%arg0: i32, %arg1: i32) -> (i32, i32, i32, i32) {
    %c0_i32 = arith.constant 0 : i32
    %c0_i32_0 = arith.constant 0 : i32
    %c0_i32_1 = arith.constant 0 : i32
    return %arg0, %arg1, %c0_i32, %c0_i32_0 : i32, i32, i32, i32
  }
  func.func @transform_1(%arg0: i32, %arg1: i32) -> (i32, i32) {
    %c0_i32 = arith.constant 0 : i32
    %c0_i32_0 = arith.constant 0 : i32
    %c0_i32_1 = arith.constant 0 : i32
    return %c0_i32, %c0_i32_0 : i32, i32
  }
  func.func @transform_2(%arg0: i32, %arg1: i32) -> (i32, i32) {
    %c0_i32 = arith.constant 0 : i32
    %c0_i32_0 = arith.constant 0 : i32
    %c0_i32_1 = arith.constant 0 : i32
    return %c0_i32, %c0_i32_0 : i32, i32
  }
  func.func @transform_3(%arg0: i32, %arg1: i32) -> (i32, i32, i32) {
    %c0_i32 = arith.constant 0 : i32
    %c0_i32_0 = arith.constant 0 : i32
    return %arg0, %arg1, %c0_i32 : i32, i32, i32
  }
}

</mosaic_0001>

<bundles_post_ra>
// kernel: conv_block_forward.1
= control target key start
LH: loop header
LB: loop body
LE: loop exit
PB: predicated region body
PF: predicated region fallthrough
CT: control target
= control target key end

     0   :  { %s1581_s12 = smov 0   ;;  %s1583_s13 = smov 0   ;;  %s2195_s0 = inlined_call_operand.vmem [shape: f32[2,3,168,4], index: 0, kind: input, shape index: {}]   ;;  %s2196_s1 = inlined_call_operand.vmem [shape: f32[36,8], index: 1, kind: input, shape index: {}]   ;;  %s2197_s2 = inlined_call_operand.vmem [shape: f32[1,8], index: 2, kind: input, shape index: {}]   ;;  %s2198_s3 = inlined_call_operand.vmem [shape: f32[2,384,8], index: 3, kind: output, shape index: {}]  }
   0x1   :  { %s1585_s14 = smov 0   ;;  %s1587_s15 = smov 0  }
   0x2   :  { %s1589_s16 = smov 0  }
   0x3 LB: > { %s22_s17 = sadd.s32 1, %s1543_s14  ;;  %s25_s18 = sadd.s32 1, %s1547_s15  ;;  %s1551_s16 = sphi %s1589_s16, %s13_s16   ;;  %s1547_s15 = sphi %s1587_s15, %s2202_s15   ;;  %s1543_s14 = sphi %s1585_s14, %s2201_s14   ;;  %s1539_s13 = sphi %s1583_s13, %s2200_s13   ;;  %s1535_s12 = sphi %s1581_s12, %s2199_s12  }
   0x4   : > { %p23_p0 = scmp.ge.s32.totalorder %s22_s17, 3  ;;  %p1373_p1 = scmp.ge.s32.totalorder %s1551_s16, 1 }
   0x5   : > { %p157_p2 = scmp.lt.s32.totalorder %s1551_s16, 7 }
   0x6   : > { %s2204_s17 = smov (%p23_p0, %s22_s17), 0  ;;  %s2206_s18 = smov (!%p23_p0, %s25_s18), %s1547_s15 }
   0x7   : > { %p158_p3 = pnand %p1373_p1, %p157_p2  ;;  %p27_p4 = scmp.ge.s32.totalorder %s2206_s18, 2 }
   0x8   : > { %p189_p5 = scmp.lt.s32.totalorder (!%p158_p3), %s1539_s13, 1  ;;  %p191_p6 = scmp.lt.s32.totalorder (!%p158_p3), %s1535_s12, 2 }
   0x9   : > { %s2208_s18 = smov (%p27_p4, %s2206_s18), 0  ;;  %161 = sbr.rel (%p158_p3) target bundleno = 599 (0x257), region = 32 }
   0xa   : > { %s1553_s27 = smov (!%p158_p3), 4   ;;  %s1554_s28 = smov (!%p158_p3), 8  }
   0xb   : > { %s1555_s29 = smov (!%p158_p3), 12   ;;  %s1556_s30 = smov (!%p158_p3), 16  }
   0xc   : > { %s1557_s4 = smov (!%p158_p3), 20   ;;  %s1558_s5 = smov (!%p158_p3), 24  }
   0xd   : > { %s1559_s6 = smov (!%p158_p3), 28   ;;  %s1560_s7 = smov (!%p158_p3), 32  }
   0xe   : > { %s2210_s13 = smov (!%p189_p5, %s1539_s13), 1  ;;  %vm224_vm0 = vcmask 31744   ;;  %v1037_v50 = vld [vmem:[%s2196_s1 + $0x20] sm:$0xf]  ;;  %vm1094_vm1 = vcmask 1043456   ;;  %v1036_v53 = vld [vmem:[%s2196_s1 + $0x18] sm:$0xff] }
   0xf   : > { %s192_s19 = scalar_select %p191_p6, %s1535_s12, 2  ;;  %1418 = vmatprep.subr.msk.mxu0 %vm1094_vm1, %v1037_v50  ;;  %1452 = vmatprep.subr.msk.mxu1 %vm1094_vm1, %v1037_v50  ;;  %v1035_v55 = vld [vmem:[%s2196_s1 + $0x10] sm:$0xff]  ;;  %v1034_v59 = vld [vmem:[%s2196_s1 + $0x8] sm:$0xff]  ;;  %v1033_v60 = vld [vmem:[%s2196_s1] sm:$0xff]  ;;  %vm321_vm2 = vcmask 64544   ;;  %vm418_vm3 = vcmask 97344  }
  0x10   : > { %s1463_s20 = smul.u32 63, %s2210_s13  ;;  %1419 = vmatpush3.msk.msra.mxu0 %vm1094_vm1, %v1037_v50  ;;  %1457 = vmatpush3.msk.msra.mxu1 %vm1094_vm1, %v1037_v50  ;;  %vm515_vm4 = vcmask 130144   ;;  %vm612_vm5 = vcmask 162944   ;;  %vm709_vm6 = vcmask 195744   ;;  %vm806_vm7 = vcmask 228544   ;;  %s1375_s25 = sshll.u32 %s1535_s12, 4 }
  0x11   : > { %s1462_s21 = smul.u32 21, %s192_s19  ;;  %1420 = vmatprep.subr.mxu0 %v1036_v53  ;;  %1453 = vmatprep.subr.mxu1 %v1036_v53  ;;  %vm903_vm8 = vcmask 261344   ;;  %vm1000_vm9 = vcmask 294144   ;;  %vm1045_vm10 = vcmask 293888   ;;  %p201_p7 = scmp.lt.s32.totalorder %s1375_s25, 47  ;;  %vm1259_vm11 = vcmask 64512  }
  0x12   : > { %1421 = vmatpush3.msra.mxu0 %v1036_v53  ;;  %1458 = vmatpush3.msra.mxu1 %v1036_v53 }
  0x13   : > { %s195_s22 = sadd.s32 %s1463_s20, %s1462_s21  ;;  %1422 = vmatprep.subr.mxu0 %v1035_v55  ;;  %1454 = vmatprep.subr.mxu1 %v1035_v55  ;;  %s2212_s25 = smov (!%p201_p7, %s1375_s25), 47 }
  0x14   : > { %s1374_s23 = sshll.u32 %s195_s22, 3  ;;  %1423 = vmatpush3.msra.mxu0 %v1035_v55  ;;  %1459 = vmatpush3.msra.mxu1 %v1035_v55 }
  0x15   : > { %s1621_s26 = scalar_lea.vmem %s2195_s0, %s1374_s23  ;;  %1424 = vmatprep.subr.mxu0 %v1034_v59  ;;  %1455 = vmatprep.subr.mxu1 %v1034_v59 }
  0x16   : > { %v242_v0 = vld [vmem:[%s1621_s26 + $0x9] sm:$0xff]  ;;  %v241_v1 = vld [vmem:[%s1621_s26 + $0x1] sm:$0xff]  ;;  %v443_v8 = vld [vmem:[%s1621_s26 + $0x52] sm:$0xff]  ;;  %1425 = vmatpush3.msra.mxu0 %v1034_v59  ;;  %1460 = vmatpush3.msra.mxu1 %v1034_v59 }
  0x17   : > { %275 = vrot.lane.b32.xlu1 %v242_v0, %s1553_s27  ;;  %273 = vrot.lane.b32.xlu0 %v241_v1, %s1553_s27  ;;  %v250_v2 = vld [vmem:[%s1621_s26 + $0x49] sm:$0xff]  ;;  %v249_v3 = vld [vmem:[%s1621_s26 + $0x41] sm:$0xff] }
  0x18   : > { %v1632_v4 = vld [vmem:[%s1621_s26 + $0x42] sm:$0xff]  ;;  %v1639_v6 = vld [vmem:[%s1621_s26 + $0x4a] sm:$0xff]  ;;  %v435_v9 = vld [vmem:[%s1621_s26 + $0x12] sm:$0xff]  ;;  %1426 = vmatprep.subr.mxu0 %v1033_v60  ;;  %1456 = vmatprep.subr.mxu1 %v1033_v60 }
  0x19   : > { %v338_v5 = vld [vmem:[%s1621_s26 + $0x2] sm:$0xff]  ;;  %v339_v7 = vld [vmem:[%s1621_s26 + $0xa] sm:$0xff]  ;;  %v444_v11 = vld [vmem:[%s1621_s26 + $0x5a] sm:$0xff]  ;;  %1427 = vmatpush3.msra.mxu0 %v1033_v60  ;;  %1461 = vmatpush3.msra.mxu1 %v1033_v60 }
  0x1a   : > { %v209_v10 = vld [vmem:[%s1621_s26 + $0x8] sm:$0xff]  ;;  %v436_v12 = vld [vmem:[%s1621_s26 + $0x1a] sm:$0xff]  ;;  %v218_v18 = vld [vmem:[%s1621_s26 + $0x50] sm:$0xff] }
  0x1b   : > { %291 = vrot.lane.b32.xlu1 %v250_v2, %s1553_s27  ;;  %289 = vrot.lane.b32.xlu0 %v249_v3, %s1553_s27  ;;  %226 = vst.msk [vmem:[#allocation2 + $0x8] sm:$0xff] %vm224_vm0, %v209_v10  ;;  %v208_v13 = vld [vmem:[%s1621_s26] sm:$0xff]  ;;  %v217_v14 = vld [vmem:[%s1621_s26 + $0x48] sm:$0xff]  ;;  %235 = vst.msk [vmem:[#allocation2 + $0x50] sm:$0xff] %vm224_vm0, %v218_v18 }
  0x1c   : > { %225 = vst.msk [vmem:[#allocation2] sm:$0xff] %vm224_vm0, %v208_v13  ;;  %v216_v15 = vld [vmem:[%s1621_s26 + $0x40] sm:$0xff]  ;;  %234 = vst.msk [vmem:[#allocation2 + $0x48] sm:$0xff] %vm224_vm0, %v217_v14  ;;  %v540_v16 = vld [vmem:[%s1621_s26 + $0x53] sm:$0xff] }
  0x1d   : > { %233 = vst.msk [vmem:[#allocation2 + $0x40] sm:$0xff] %vm224_vm0, %v216_v15  ;;  %v532_v17 = vld [vmem:[%s1621_s26 + $0x13] sm:$0xff]  ;;  %v541_v24 = vld [vmem:[%s1621_s26 + $0x5b] sm:$0xff]  ;;  %v1702_v32 = vld [vmem:[%s1621_s26 + $0x64] sm:$0xff] }
  0x1e   : > { %v210_v19 = vld [vmem:[%s1621_s26 + $0x10] sm:$0xff]  ;;  %v219_v22 = vld [vmem:[%s1621_s26 + $0x58] sm:$0xff]  ;;  %v1705_v33 = vld [vmem:[%s1621_s26 + $0x24] sm:$0xff] }
  0x1f   : > { %386 = vrot.lane.b32.xlu1 %v1632_v4, %s1554_s28  ;;  %370 = vrot.lane.b32.xlu0 %v338_v5, %s1554_s28  ;;  %227 = vst.msk [vmem:[#allocation2 + $0x10] sm:$0xff] %vm224_vm0, %v210_v19  ;;  %v251_v20 = vld [vmem:[%s1621_s26 + $0x51] sm:$0xff]  ;;  %236 = vst.msk [vmem:[#allocation2 + $0x58] sm:$0xff] %vm224_vm0, %v219_v22  ;;  %v533_v25 = vld [vmem:[%s1621_s26 + $0x1b] sm:$0xff] }
  0x20   : > { %v243_v21 = vld [vmem:[%s1621_s26 + $0x11] sm:$0xff]  ;;  %v252_v28 = vld [vmem:[%s1621_s26 + $0x59] sm:$0xff]  ;;  %v1714_v34 = vld [vmem:[%s1621_s26 + $0x62] sm:$0xff] }
  0x21   : > { %v211_v23 = vld [vmem:[%s1621_s26 + $0x18] sm:$0xff]  ;;  %v1717_v35 = vld [vmem:[%s1621_s26 + $0x22] sm:$0xff]  ;;  %v1724_v36 = vld [vmem:[%s1621_s26 + $0x6c] sm:$0xff] }
  0x22   : > { %228 = vst.msk [vmem:[#allocation2 + $0x18] sm:$0xff] %vm224_vm0, %v211_v23  ;;  %v1682_v26 = vld [vmem:[%s1621_s26 + $0x54] sm:$0xff]  ;;  %v1695_v30 = vld [vmem:[%s1621_s26 + $0x5c] sm:$0xff]  ;;  %v1727_v37 = vld [vmem:[%s1621_s26 + $0x2c] sm:$0xff] }
  0x23   : > { %388 = vrot.lane.b32.xlu1 %v1639_v6, %s1554_s28  ;;  %372 = vrot.lane.b32.xlu0 %v339_v7, %s1554_s28  ;;  %v629_v27 = vld [vmem:[%s1621_s26 + $0x14] sm:$0xff]  ;;  %v630_v31 = vld [vmem:[%s1621_s26 + $0x1c] sm:$0xff] }
  0x24   : > { %v244_v29 = vld [vmem:[%s1621_s26 + $0x19] sm:$0xff]  ;;  %v831_v38 = vld [vmem:[%s1621_s26 + $0x65] sm:$0xff]  ;;  %v832_v46 = vld [vmem:[%s1621_s26 + $0x6d] sm:$0xff] }
  0x25   : > { %v823_v39 = vld [vmem:[%s1621_s26 + $0x25] sm:$0xff]  ;;  %v824_v47 = vld [vmem:[%s1621_s26 + $0x2d] sm:$0xff]  ;;  %v1841_v13 = vld [vmem:[%s1621_s26 + $0x7c] sm:$0xff] }
  0x26   : > { %v1738_v40 = vld [vmem:[%s1621_s26 + $0x6a] sm:$0xff]  ;;  %v220_v44 = vld [vmem:[%s1621_s26 + $0x60] sm:$0xff]  ;;  %v1811_v1 = vld [vmem:[%s1621_s26 + $0x74] sm:$0xff] }
  0x27   : > { %483 = vrot.lane.b32.xlu1 %v443_v8, %s1555_s29  ;;  %467 = vrot.lane.b32.xlu0 %v435_v9, %s1555_s29  ;;  %v1741_v41 = vld [vmem:[%s1621_s26 + $0x2a] sm:$0xff]  ;;  %v212_v45 = vld [vmem:[%s1621_s26 + $0x20] sm:$0xff]  ;;  %237 = vst.msk [vmem:[#allocation2 + $0x60] sm:$0xff] %vm224_vm0, %v220_v44 }
  0x28   : > { %v542_v42 = vld [vmem:[%s1621_s26 + $0x63] sm:$0xff]  ;;  %229 = vst.msk [vmem:[#allocation2 + $0x20] sm:$0xff] %vm224_vm0, %v212_v45  ;;  %v543_v54 = vld [vmem:[%s1621_s26 + $0x6b] sm:$0xff]  ;;  %v1814_v2 = vld [vmem:[%s1621_s26 + $0x34] sm:$0xff] }
  0x29   : > { %v534_v43 = vld [vmem:[%s1621_s26 + $0x23] sm:$0xff]  ;;  %v535_v56 = vld [vmem:[%s1621_s26 + $0x2b] sm:$0xff]  ;;  %v825_v18 = vld [vmem:[%s1621_s26 + $0x35] sm:$0xff] }
  0x2a   : > { %v928_v48 = vld [vmem:[%s1621_s26 + $0x66] sm:$0xff]  ;;  %v929_v61 = vld [vmem:[%s1621_s26 + $0x6e] sm:$0xff]  ;;  %v1844_v14 = vld [vmem:[%s1621_s26 + $0x3c] sm:$0xff] }
  0x2b   : > { %485 = vrot.lane.b32.xlu1 %v444_v11, %s1555_s29  ;;  %469 = vrot.lane.b32.xlu0 %v436_v12, %s1555_s29  ;;  %v920_v49 = vld [vmem:[%s1621_s26 + $0x26] sm:$0xff]  ;;  %v921_v62 = vld [vmem:[%s1621_s26 + $0x2e] sm:$0xff] }
  0x2c   : > { %v253_v51 = vld [vmem:[%s1621_s26 + $0x61] sm:$0xff]  ;;  %v254_v63 = vld [vmem:[%s1621_s26 + $0x69] sm:$0xff]  ;;  %v1832_v10 = vld [vmem:[%s1621_s26 + $0x32] sm:$0xff] }
  0x2d   : > { %v245_v52 = vld [vmem:[%s1621_s26 + $0x21] sm:$0xff]  ;;  %v246_v0 = vld [vmem:[%s1621_s26 + $0x29] sm:$0xff] }
  0x2e   : > { %v221_v57 = vld [vmem:[%s1621_s26 + $0x68] sm:$0xff]  ;;  %v1862_v22 = vld [vmem:[%s1621_s26 + $0x3a] sm:$0xff] }
  0x2f   : > { %580 = vrot.lane.b32.xlu1 %v540_v16, %s1556_s30  ;;  %564 = vrot.lane.b32.xlu0 %v532_v17, %s1556_s30  ;;  %v213_v58 = vld [vmem:[%s1621_s26 + $0x28] sm:$0xff]  ;;  %238 = vst.msk [vmem:[#allocation2 + $0x68] sm:$0xff] %vm224_vm0, %v221_v57  ;;  %v833_v17 = vld [vmem:[%s1621_s26 + $0x75] sm:$0xff] }
  0x30   : > { %230 = vst.msk [vmem:[#allocation2 + $0x28] sm:$0xff] %vm224_vm0, %v213_v58  ;;  %v545_v45 = vld [vmem:[%s1621_s26 + $0x7b] sm:$0xff] }
  0x31   : > { %v931_v53 = vld [vmem:[%s1621_s26 + $0x7e] sm:$0xff] }
  0x32   : > { %v256_v57 = vld [vmem:[%s1621_s26 + $0x79] sm:$0xff] }
  0x33   : > { %293 = vrot.lane.b32.xlu1 %v251_v20, %s1553_s27  ;;  %277 = vrot.lane.b32.xlu0 %v243_v21, %s1553_s27  ;;  %v1859_v21 = vld [vmem:[%s1621_s26 + $0x7a] sm:$0xff] }
  0x34   : > { %v248_v58 = vld [vmem:[%s1621_s26 + $0x39] sm:$0xff] }
  0x37   : > { %582 = vrot.lane.b32.xlu1 %v541_v24, %s1556_s30  ;;  %566 = vrot.lane.b32.xlu0 %v533_v25, %s1556_s30  ;;  %v544_v25 = vld [vmem:[%s1621_s26 + $0x73] sm:$0xff] }
  0x3b   : > { %677 = vrot.lane.b32.xlu1 %v1682_v26, %s1557_s4  ;;  %661 = vrot.lane.b32.xlu0 %v629_v27, %s1557_s4  ;;  %v536_v27 = vld [vmem:[%s1621_s26 + $0x33] sm:$0xff] }
  0x3f   : > { %295 = vrot.lane.b32.xlu1 %v252_v28, %s1553_s27  ;;  %279 = vrot.lane.b32.xlu0 %v244_v29, %s1553_s27  ;;  %v222_v28 = vld [vmem:[%s1621_s26 + $0x70] sm:$0xff] }
  0x40   : > { %v214_v29 = vld [vmem:[%s1621_s26 + $0x30] sm:$0xff]  ;;  %239 = vst.msk [vmem:[#allocation2 + $0x70] sm:$0xff] %vm224_vm0, %v222_v28 }
  0x41   : > { %231 = vst.msk [vmem:[#allocation2 + $0x30] sm:$0xff] %vm224_vm0, %v214_v29  ;;  %v828_v28 = vld [vmem:[%s1621_s26 + $0x4d] sm:$0xff] }
  0x43   : > { %390 = vrot.lane.b32.xlu1 %v443_v8, %s1554_s28  ;;  %374 = vrot.lane.b32.xlu0 %v435_v9, %s1554_s28  ;;  %v1829_v9 = vld [vmem:[%s1621_s26 + $0x72] sm:$0xff] }
  0x47   : > { %679 = vrot.lane.b32.xlu1 %v1695_v30, %s1557_s4  ;;  %663 = vrot.lane.b32.xlu0 %v630_v31, %s1557_s4 }
  0x4b   : > { %774 = vrot.lane.b32.xlu1 %v1702_v32, %s1558_s5  ;;  %758 = vrot.lane.b32.xlu0 %v1705_v33, %s1558_s5 }
  0x4f   : > { %392 = vrot.lane.b32.xlu1 %v444_v11, %s1554_s28  ;;  %376 = vrot.lane.b32.xlu0 %v436_v12, %s1554_s28 }
  0x53   : > { %487 = vrot.lane.b32.xlu1 %v1714_v34, %s1555_s29  ;;  %471 = vrot.lane.b32.xlu0 %v1717_v35, %s1555_s29 }
  0x57   : > { %776 = vrot.lane.b32.xlu1 %v1724_v36, %s1558_s5  ;;  %760 = vrot.lane.b32.xlu0 %v1727_v37, %s1558_s5 }
  0x5b   : > { %871 = vrot.lane.b32.xlu1 %v831_v38, %s1559_s6  ;;  %855 = vrot.lane.b32.xlu0 %v823_v39, %s1559_s6  ;;  %v922_v38 = vld [vmem:[%s1621_s26 + $0x36] sm:$0xff] }
  0x5f   : > { %489 = vrot.lane.b32.xlu1 %v1738_v40, %s1555_s29  ;;  %473 = vrot.lane.b32.xlu0 %v1741_v41, %s1555_s29 }
  0x63   : > { %584 = vrot.lane.b32.xlu1 %v542_v42, %s1556_s30  ;;  %568 = vrot.lane.b32.xlu0 %v534_v43, %s1556_s30  ;;  %v247_v42 = vld [vmem:[%s1621_s26 + $0x31] sm:$0xff] }
  0x67   : > { %873 = vrot.lane.b32.xlu1 %v832_v46, %s1559_s6  ;;  %857 = vrot.lane.b32.xlu0 %v824_v47, %s1559_s6  ;;  %v537_v46 = vld [vmem:[%s1621_s26 + $0x3b] sm:$0xff] }
  0x68   : > { %v223_v47 = vld [vmem:[%s1621_s26 + $0x78] sm:$0xff] }
  0x69   : > { %240 = vst.msk [vmem:[#allocation2 + $0x78] sm:$0xff] %vm224_vm0, %v223_v47 }
  0x6b   : > { %968 = vrot.lane.b32.xlu1 %v928_v48, %s1560_s7  ;;  %952 = vrot.lane.b32.xlu0 %v920_v49, %s1560_s7  ;;  %v215_v48 = vld [vmem:[%s1621_s26 + $0x38] sm:$0xff] }
  0x6c   : > { %232 = vst.msk [vmem:[#allocation2 + $0x38] sm:$0xff] %vm224_vm0, %v215_v48 }
  0x6f   : > { %297 = vrot.lane.b32.xlu1 %v253_v51, %s1553_s27  ;;  %281 = vrot.lane.b32.xlu0 %v245_v52, %s1553_s27 }
  0x73   : > { %586 = vrot.lane.b32.xlu1 %v543_v54, %s1556_s30  ;;  %570 = vrot.lane.b32.xlu0 %v535_v56, %s1556_s30  ;;  %v923_v54 = vld [vmem:[%s1621_s26 + $0x3e] sm:$0xff] }
  0x77   : > { %681 = vrot.lane.b32.xlu1 %v1702_v32, %s1557_s4  ;;  %665 = vrot.lane.b32.xlu0 %v1705_v33, %s1557_s4  ;;  %v834_v33 = vld [vmem:[%s1621_s26 + $0x7d] sm:$0xff] }
  0x7b   : > { %970 = vrot.lane.b32.xlu1 %v929_v61, %s1560_s7  ;;  %954 = vrot.lane.b32.xlu0 %v921_v62, %s1560_s7 }
  0x7f   : > { %299 = vrot.lane.b32.xlu1 %v254_v63, %s1553_s27  ;;  %283 = vrot.lane.b32.xlu0 %v246_v0, %s1553_s27 }
  0x83   : > { %394 = vrot.lane.b32.xlu1 %v1714_v34, %s1554_s28  ;;  %378 = vrot.lane.b32.xlu0 %v1717_v35, %s1554_s28  ;;  %v826_v34 = vld [vmem:[%s1621_s26 + $0x3d] sm:$0xff] }
  0x87   : > { %683 = vrot.lane.b32.xlu1 %v1724_v36, %s1557_s4  ;;  %667 = vrot.lane.b32.xlu0 %v1727_v37, %s1557_s4  ;;  %v930_v37 = vld [vmem:[%s1621_s26 + $0x76] sm:$0xff] }
  0x89   : > { %v276_v3 = vpop.permute.xlu1 %275  ;;  %v274_v5 = vpop.permute.xlu0 %273 }
  0x8a   : > { %323 = vst.msk [vmem:[#allocation2 + $0x8] sm:$0xff] %vm321_vm2, %v276_v3  ;;  %322 = vst.msk [vmem:[#allocation2] sm:$0xff] %vm321_vm2, %v274_v5 }
  0x8b   : > { %778 = vrot.lane.b32.xlu1 %v1811_v1, %s1558_s5  ;;  %762 = vrot.lane.b32.xlu0 %v1814_v2, %s1558_s5 }
  0x8d   : > { %v292_v7 = vpop.permute.xlu1 %291  ;;  %v290_v8 = vpop.permute.xlu0 %289 }
  0x8e   : > { %331 = vst.msk [vmem:[#allocation2 + $0x48] sm:$0xff] %vm321_vm2, %v292_v7  ;;  %330 = vst.msk [vmem:[#allocation2 + $0x40] sm:$0xff] %vm321_vm2, %v290_v8 }
  0x8f   : > { %396 = vrot.lane.b32.xlu1 %v1738_v40, %s1554_s28  ;;  %380 = vrot.lane.b32.xlu0 %v1741_v41, %s1554_s28  ;;  %v255_v41 = vld [vmem:[%s1621_s26 + $0x71] sm:$0xff] }
  0x91   : > { %v387_v11 = vpop.permute.xlu1 %386  ;;  %v371_v12 = vpop.permute.xlu0 %370 }
  0x92   : > { %427 = vst.msk [vmem:[#allocation2 + $0x40] sm:$0xff] %vm418_vm3, %v387_v11  ;;  %419 = vst.msk [vmem:[#allocation2] sm:$0xff] %vm418_vm3, %v371_v12  ;;  %v1963_v12 = vld [vmem:[%s1621_s26 + $0x8c] sm:$0xff] }
  0x93   : > { %491 = vrot.lane.b32.xlu1 %v1829_v9, %s1555_s29  ;;  %475 = vrot.lane.b32.xlu0 %v1832_v10, %s1555_s29 }
  0x95   : > { %v389_v15 = vpop.permute.xlu1 %388  ;;  %v373_v16 = vpop.permute.xlu0 %372 }
  0x96   : > { %428 = vst.msk [vmem:[#allocation2 + $0x48] sm:$0xff] %vm418_vm3, %v389_v15  ;;  %420 = vst.msk [vmem:[#allocation2 + $0x8] sm:$0xff] %vm418_vm3, %v373_v16  ;;  %v835_v16 = vld [vmem:[%s1621_s26 + $0x85] sm:$0xff] }
  0x97   : > { %780 = vrot.lane.b32.xlu1 %v1841_v13, %s1558_s5  ;;  %764 = vrot.lane.b32.xlu0 %v1844_v14, %s1558_s5 }
  0x99   : > { %v484_v19 = vpop.permute.xlu1 %483  ;;  %v468_v20 = vpop.permute.xlu0 %467 }
  0x9a   : > { %524 = vst.msk [vmem:[#allocation2 + $0x40] sm:$0xff] %vm515_vm4, %v484_v19  ;;  %516 = vst.msk [vmem:[#allocation2] sm:$0xff] %vm515_vm4, %v468_v20  ;;  %v450_v19 = vld [vmem:[%s1621_s26 + $0x8a] sm:$0xff] }
  0x9b   : > { %875 = vrot.lane.b32.xlu1 %v833_v17, %s1559_s6  ;;  %859 = vrot.lane.b32.xlu0 %v825_v18, %s1559_s6 }
  0x9d   : > { %v486_v23 = vpop.permute.xlu1 %485  ;;  %v470_v24 = vpop.permute.xlu0 %469 }
  0x9e   : > { %525 = vst.msk [vmem:[#allocation2 + $0x48] sm:$0xff] %vm515_vm4, %v486_v23  ;;  %517 = vst.msk [vmem:[#allocation2 + $0x8] sm:$0xff] %vm515_vm4, %v470_v24  ;;  %v538_v23 = vld [vmem:[%s1621_s26 + $0x43] sm:$0xff] }
  0x9f   : > { %493 = vrot.lane.b32.xlu1 %v1859_v21, %s1555_s29  ;;  %477 = vrot.lane.b32.xlu0 %v1862_v22, %s1555_s29 }
  0xa1   : > { %v581_v31 = vpop.permute.xlu1 %580  ;;  %v565_v32 = vpop.permute.xlu0 %564 }
  0xa2   : > { %621 = vst.msk [vmem:[#allocation2 + $0x40] sm:$0xff] %vm612_vm5, %v581_v31  ;;  %613 = vst.msk [vmem:[#allocation2] sm:$0xff] %vm612_vm5, %v565_v32 }
  0xa3   : > { %588 = vrot.lane.b32.xlu1 %v544_v25, %s1556_s30  ;;  %572 = vrot.lane.b32.xlu0 %v536_v27, %s1556_s30  ;;  %v836_v27 = vld [vmem:[%s1621_s26 + $0x8d] sm:$0xff] }
  0xa5   : > { %v294_v35 = vpop.permute.xlu1 %293  ;;  %v278_v36 = vpop.permute.xlu0 %277 }
  0xa6   : > { %332 = vst.msk [vmem:[#allocation2 + $0x50] sm:$0xff] %vm321_vm2, %v294_v35  ;;  %324 = vst.msk [vmem:[#allocation2 + $0x10] sm:$0xff] %vm321_vm2, %v278_v36 }
  0xa7   : > { %877 = vrot.lane.b32.xlu1 %v834_v33, %s1559_s6  ;;  %861 = vrot.lane.b32.xlu0 %v826_v34, %s1559_s6  ;;  %v932_v33 = vld [vmem:[%s1621_s26 + $0x86] sm:$0xff] }
  0xa8   : > { %v924_v34 = vld [vmem:[%s1621_s26 + $0x46] sm:$0xff] }
  0xa9   : > { %v583_v39 = vpop.permute.xlu1 %582  ;;  %v567_v40 = vpop.permute.xlu0 %566 }
  0xaa   : > { %622 = vst.msk [vmem:[#allocation2 + $0x48] sm:$0xff] %vm612_vm5, %v583_v39  ;;  %614 = vst.msk [vmem:[#allocation2 + $0x8] sm:$0xff] %vm612_vm5, %v567_v40 }
  0xab   : > { %972 = vrot.lane.b32.xlu1 %v930_v37, %s1560_s7  ;;  %956 = vrot.lane.b32.xlu0 %v922_v38, %s1560_s7  ;;  %v547_v37 = vld [vmem:[%s1621_s26 + $0x8b] sm:$0xff] }
  0xac   : > { %v539_v38 = vld [vmem:[%s1621_s26 + $0x4b] sm:$0xff] }
  0xad   : > { %v678_v43 = vpop.permute.xlu1 %677  ;;  %v662_v44 = vpop.permute.xlu0 %661 }
  0xae   : > { %718 = vst.msk [vmem:[#allocation2 + $0x40] sm:$0xff] %vm709_vm6, %v678_v43  ;;  %710 = vst.msk [vmem:[#allocation2] sm:$0xff] %vm709_vm6, %v662_v44  ;;  %v933_v43 = vld [vmem:[%s1621_s26 + $0x8e] sm:$0xff] }
  0xaf   : > { %301 = vrot.lane.b32.xlu1 %v255_v41, %s1553_s27  ;;  %285 = vrot.lane.b32.xlu0 %v247_v42, %s1553_s27  ;;  %v925_v44 = vld [vmem:[%s1621_s26 + $0x4e] sm:$0xff] }
  0xb1   : > { %v296_v49 = vpop.permute.xlu1 %295  ;;  %v280_v50 = vpop.permute.xlu0 %279 }
  0xb2   : > { %333 = vst.msk [vmem:[#allocation2 + $0x58] sm:$0xff] %vm321_vm2, %v296_v49  ;;  %325 = vst.msk [vmem:[#allocation2 + $0x18] sm:$0xff] %vm321_vm2, %v280_v50 }
  0xb3   : > { %590 = vrot.lane.b32.xlu1 %v545_v45, %s1556_s30  ;;  %574 = vrot.lane.b32.xlu0 %v537_v46, %s1556_s30 }
  0xb5   : > { %v391_v51 = vpop.permute.xlu1 %390  ;;  %v375_v52 = vpop.permute.xlu0 %374 }
  0xb6   : > { %429 = vst.msk [vmem:[#allocation2 + $0x50] sm:$0xff] %vm418_vm3, %v391_v51  ;;  %421 = vst.msk [vmem:[#allocation2 + $0x10] sm:$0xff] %vm418_vm3, %v375_v52  ;;  %v740_v51 = vld [vmem:[%s1621_s26 + $0x94] sm:$0xff] }
  0xb7   : > { %685 = vrot.lane.b32.xlu1 %v1811_v1, %s1557_s4  ;;  %669 = vrot.lane.b32.xlu0 %v1814_v2, %s1557_s4  ;;  %v1939_v1 = vld [vmem:[%s1621_s26 + $0x84] sm:$0xff] }
  0xb8   : > { %v1942_v2 = vld [vmem:[%s1621_s26 + $0x44] sm:$0xff] }
  0xb9   : > { %v680_v55 = vpop.permute.xlu1 %679  ;;  %v664_v56 = vpop.permute.xlu0 %663 }
  0xba   : > { %719 = vst.msk [vmem:[#allocation2 + $0x48] sm:$0xff] %vm709_vm6, %v680_v55  ;;  %711 = vst.msk [vmem:[#allocation2 + $0x8] sm:$0xff] %vm709_vm6, %v664_v56 }
  0xbb   : > { %974 = vrot.lane.b32.xlu1 %v931_v53, %s1560_s7  ;;  %958 = vrot.lane.b32.xlu0 %v923_v54, %s1560_s7  ;;  %v741_v54 = vld [vmem:[%s1621_s26 + $0x9c] sm:$0xff] }
  0xbd   : > { %v775_v59 = vpop.permute.xlu1 %774  ;;  %v759_v60 = vpop.permute.xlu0 %758 }
  0xbe   : > { %815 = vst.msk [vmem:[#allocation2 + $0x40] sm:$0xff] %vm806_vm7, %v775_v59  ;;  %807 = vst.msk [vmem:[#allocation2] sm:$0xff] %vm806_vm7, %v759_v60  ;;  %v838_v60 = vld [vmem:[%s1621_s26 + $0x9d] sm:$0xff] }
  0xbf   : > { %303 = vrot.lane.b32.xlu1 %v256_v57, %s1553_s27  ;;  %287 = vrot.lane.b32.xlu0 %v248_v58, %s1553_s27  ;;  %v837_v57 = vld [vmem:[%s1621_s26 + $0x95] sm:$0xff] }
  0xc0   : > { %v829_v58 = vld [vmem:[%s1621_s26 + $0x55] sm:$0xff] }
  0xc1   : > { %v393_v61 = vpop.permute.xlu1 %392  ;;  %v377_v62 = vpop.permute.xlu0 %376 }
  0xc2   : > { %430 = vst.msk [vmem:[#allocation2 + $0x58] sm:$0xff] %vm418_vm3, %v393_v61  ;;  %422 = vst.msk [vmem:[#allocation2 + $0x18] sm:$0xff] %vm418_vm3, %v377_v62  ;;  %v830_v61 = vld [vmem:[%s1621_s26 + $0x5d] sm:$0xff] }
  0xc3   : > { %398 = vrot.lane.b32.xlu1 %v1829_v9, %s1554_s28  ;;  %382 = vrot.lane.b32.xlu0 %v1832_v10, %s1554_s28  ;;  %v449_v9 = vld [vmem:[%s1621_s26 + $0x82] sm:$0xff] }
  0xc5   : > { %v488_v63 = vpop.permute.xlu1 %487  ;;  %v472_v0 = vpop.permute.xlu0 %471 }
  0xc6   : > { %526 = vst.msk [vmem:[#allocation2 + $0x50] sm:$0xff] %vm515_vm4, %v488_v63  ;;  %518 = vst.msk [vmem:[#allocation2 + $0x10] sm:$0xff] %vm515_vm4, %v472_v0  ;;  %v934_v63 = vld [vmem:[%s1621_s26 + $0x96] sm:$0xff] }
  0xc7   : > { %687 = vrot.lane.b32.xlu1 %v1841_v13, %s1557_s4  ;;  %671 = vrot.lane.b32.xlu0 %v1844_v14, %s1557_s4  ;;  %v1966_v13 = vld [vmem:[%s1621_s26 + $0x4c] sm:$0xff]  ;;  %v926_v0 = vld [vmem:[%s1621_s26 + $0x56] sm:$0xff] }
  0xc9   : > { %v777_v3 = vpop.permute.xlu1 %776  ;;  %v761_v5 = vpop.permute.xlu0 %760 }
  0xca   : > { %816 = vst.msk [vmem:[#allocation2 + $0x48] sm:$0xff] %vm806_vm7, %v777_v3  ;;  %808 = vst.msk [vmem:[#allocation2 + $0x8] sm:$0xff] %vm806_vm7, %v761_v5  ;;  %v935_v3 = vld [vmem:[%s1621_s26 + $0x9e] sm:$0xff] }
  0xcb   : > { %782 = vrot.lane.b32.xlu1 %v1939_v1, %s1558_s5  ;;  %766 = vrot.lane.b32.xlu0 %v1942_v2, %s1558_s5  ;;  %v927_v5 = vld [vmem:[%s1621_s26 + $0x5e] sm:$0xff] }
  0xcd   : > { %v872_v7 = vpop.permute.xlu1 %871  ;;  %v856_v8 = vpop.permute.xlu0 %855 }
  0xce   : > { %912 = vst.msk [vmem:[#allocation2 + $0x40] sm:$0xff] %vm903_vm8, %v872_v7  ;;  %904 = vst.msk [vmem:[#allocation2] sm:$0xff] %vm903_vm8, %v856_v8 }
  0xcf   : > { %400 = vrot.lane.b32.xlu1 %v1859_v21, %s1554_s28  ;;  %384 = vrot.lane.b32.xlu0 %v1862_v22, %s1554_s28  ;;  %v546_v22 = vld [vmem:[%s1621_s26 + $0x83] sm:$0xff] }
  0xd1   : > { %v490_v10 = vpop.permute.xlu1 %489  ;;  %v474_v11 = vpop.permute.xlu0 %473 }
  0xd2   : > { %527 = vst.msk [vmem:[#allocation2 + $0x58] sm:$0xff] %vm515_vm4, %v490_v10  ;;  %519 = vst.msk [vmem:[#allocation2 + $0x18] sm:$0xff] %vm515_vm4, %v474_v11 }
  0xd3   : > { %495 = vrot.lane.b32.xlu1 %v449_v9, %s1555_s29  ;;  %479 = vrot.lane.b32.xlu0 %v1632_v4, %s1555_s29  ;;  %v827_v4 = vld [vmem:[%s1621_s26 + $0x45] sm:$0xff]  ;;  %s1464_s26 = smul.u32 48, %s2210_s13 }
  0xd5   : > { %v585_v14 = vpop.permute.xlu1 %584  ;;  %v569_v15 = vpop.permute.xlu0 %568  ;;  %s204_s27 = sadd.s32 %s1464_s26, %s2212_s25 }
  0xd6   : > { %623 = vst.msk [vmem:[#allocation2 + $0x50] sm:$0xff] %vm612_vm5, %v585_v14  ;;  %615 = vst.msk [vmem:[#allocation2 + $0x10] sm:$0xff] %vm612_vm5, %v569_v15 }
  0xd7   : > { %784 = vrot.lane.b32.xlu1 %v1963_v12, %s1558_s5  ;;  %768 = vrot.lane.b32.xlu0 %v1966_v13, %s1558_s5 }
  0xd9   : > { %v874_v17 = vpop.permute.xlu1 %873  ;;  %v858_v18 = vpop.permute.xlu0 %857 }
  0xda   : > { %913 = vst.msk [vmem:[#allocation2 + $0x48] sm:$0xff] %vm903_vm8, %v874_v17  ;;  %905 = vst.msk [vmem:[#allocation2 + $0x8] sm:$0xff] %vm903_vm8, %v858_v18 }
  0xdb   : > { %879 = vrot.lane.b32.xlu1 %v835_v16, %s1559_s6  ;;  %863 = vrot.lane.b32.xlu0 %v827_v4, %s1559_s6 }
  0xdd   : > { %v969_v20 = vpop.permute.xlu1 %968  ;;  %v953_v21 = vpop.permute.xlu0 %952 }
  0xde   : > { %1009 = vst.msk [vmem:[#allocation2 + $0x40] sm:$0xff] %vm1000_vm9, %v969_v20  ;;  %1001 = vst.msk [vmem:[#allocation2] sm:$0xff] %vm1000_vm9, %v953_v21 }
  0xdf   : > { %497 = vrot.lane.b32.xlu1 %v450_v19, %s1555_s29  ;;  %481 = vrot.lane.b32.xlu0 %v1639_v6, %s1555_s29 }
  0xe1   : > { %v298_v24 = vpop.permute.xlu1 %297  ;;  %v282_v25 = vpop.permute.xlu0 %281 }
  0xe2   : > { %334 = vst.msk [vmem:[#allocation2 + $0x60] sm:$0xff] %vm321_vm2, %v298_v24  ;;  %326 = vst.msk [vmem:[#allocation2 + $0x20] sm:$0xff] %vm321_vm2, %v282_v25 }
  0xe3   : > { %592 = vrot.lane.b32.xlu1 %v546_v22, %s1556_s30  ;;  %576 = vrot.lane.b32.xlu0 %v538_v23, %s1556_s30 }
  0xe5   : > { %v587_v29 = vpop.permute.xlu1 %586  ;;  %v571_v31 = vpop.permute.xlu0 %570  ;;  %v1017_v6 = vld [vmem:[#allocation2] sm:$0xff] }
  0xe6   : > { %v1025_v32 = vld [vmem:[#allocation2 + $0x40] sm:$0xff]  ;;  %624 = vst.msk [vmem:[#allocation2 + $0x58] sm:$0xff] %vm612_vm5, %v587_v29  ;;  %616 = vst.msk [vmem:[#allocation2 + $0x18] sm:$0xff] %vm612_vm5, %v571_v31  ;;  %1428 = vmatprep.mubr.msk.f32.mxu0 %vm1045_vm10, %v1017_v6 }
  0xe7   : > { %1440 = vmatprep.mubr.msk.f32.mxu1 %vm1045_vm10, %v1025_v32  ;;  %881 = vrot.lane.b32.xlu1 %v836_v27, %s1559_s6 }
  0xe8   : > { %865 = vrot.lane.b32.xlu0 %v828_v28, %s1559_s6 }
  0xe9   : > { %v682_v35 = vpop.permute.xlu1 %681  ;;  %v666_v36 = vpop.permute.xlu0 %665 }
  0xea   : > { %720 = vst.msk [vmem:[#allocation2 + $0x50] sm:$0xff] %vm709_vm6, %v682_v35  ;;  %712 = vst.msk [vmem:[#allocation2 + $0x10] sm:$0xff] %vm709_vm6, %v666_v36 }
  0xeb   : > { %976 = vrot.lane.b32.xlu1 %v932_v33, %s1560_s7 }
  0xec   : > { %960 = vrot.lane.b32.xlu0 %v924_v34, %s1560_s7 }
  0xed   : > { %v971_v39 = vpop.permute.xlu1 %970  ;;  %v955_v40 = vpop.permute.xlu0 %954 }
  0xee   : > { %1010 = vst.msk [vmem:[#allocation2 + $0x48] sm:$0xff] %vm1000_vm9, %v971_v39  ;;  %1002 = vst.msk [vmem:[#allocation2 + $0x8] sm:$0xff] %vm1000_vm9, %v955_v40 }
  0xef   : > { %594 = vrot.lane.b32.xlu1 %v547_v37, %s1556_s30 }
  0xf0   : > { %578 = vrot.lane.b32.xlu0 %v539_v38, %s1556_s30  ;;  %s1376_s30 = sshll.u32 %s204_s27, 3 }
  0xf1   : > { %v300_v41 = vpop.permute.xlu1 %299  ;;  %v284_v42 = vpop.permute.xlu0 %283 }
  0xf2   : > { %335 = vst.msk [vmem:[#allocation2 + $0x68] sm:$0xff] %vm321_vm2, %v300_v41  ;;  %327 = vst.msk [vmem:[#allocation2 + $0x28] sm:$0xff] %vm321_vm2, %v284_v42 }
  0xf3   : > { %689 = vrot.lane.b32.xlu1 %v1939_v1, %s1557_s4 }
  0xf4   : > { %673 = vrot.lane.b32.xlu0 %v1942_v2, %s1557_s4 }
  0xf5   : > { %v395_v45 = vpop.permute.xlu1 %394  ;;  %v379_v46 = vpop.permute.xlu0 %378  ;;  %v1018_v47 = vld [vmem:[#allocation2 + $0x8] sm:$0xff] }
  0xf6   : > { %v1026_v48 = vld [vmem:[#allocation2 + $0x48] sm:$0xff]  ;;  %431 = vst.msk [vmem:[#allocation2 + $0x60] sm:$0xff] %vm418_vm3, %v395_v45  ;;  %423 = vst.msk [vmem:[#allocation2 + $0x20] sm:$0xff] %vm418_vm3, %v379_v46  ;;  %1429 = vmatmul.mubr.msk.f32.vlgmr.msra.gmra.mxu0 %vm1045_vm10, %v1018_v47 }
  0xf7   : > { %1441 = vmatmul.mubr.msk.f32.vlgmr.msra.gmra.mxu1 %vm1045_vm10, %v1026_v48  ;;  %978 = vrot.lane.b32.xlu1 %v933_v43, %s1560_s7 }
  0xf8   : > { %962 = vrot.lane.b32.xlu0 %v925_v44, %s1560_s7 }
  0xf9   : > { %v684_v49 = vpop.permute.xlu1 %683  ;;  %v668_v50 = vpop.permute.xlu0 %667 }
  0xfa   : > { %721 = vst.msk [vmem:[#allocation2 + $0x58] sm:$0xff] %vm709_vm6, %v684_v49  ;;  %713 = vst.msk [vmem:[#allocation2 + $0x18] sm:$0xff] %vm709_vm6, %v668_v50 }
  0xfb   : > { %691 = vrot.lane.b32.xlu1 %v1963_v12, %s1557_s4 }
  0xfc   : > { %675 = vrot.lane.b32.xlu0 %v1966_v13, %s1557_s4 }
  0xfd   : > { %v779_v52 = vpop.permute.xlu1 %778  ;;  %v763_v53 = vpop.permute.xlu0 %762 }
  0xfe   : > { %817 = vst.msk [vmem:[#allocation2 + $0x50] sm:$0xff] %vm806_vm7, %v779_v52  ;;  %809 = vst.msk [vmem:[#allocation2 + $0x10] sm:$0xff] %vm806_vm7, %v763_v53 }
  0xff   : > { %786 = vrot.lane.b32.xlu1 %v740_v51, %s1558_s5 }
 0x100   : > { %770 = vrot.lane.b32.xlu0 %v1682_v26, %s1558_s5 }
 0x101   : > { %v397_v55 = vpop.permute.xlu1 %396  ;;  %v381_v56 = vpop.permute.xlu0 %380 }
 0x102   : > { %432 = vst.msk [vmem:[#allocation2 + $0x68] sm:$0xff] %vm418_vm3, %v397_v55  ;;  %424 = vst.msk [vmem:[#allocation2 + $0x28] sm:$0xff] %vm418_vm3, %v381_v56 }
 0x103   : > { %788 = vrot.lane.b32.xlu1 %v741_v54, %s1558_s5 }
 0x104   : > { %772 = vrot.lane.b32.xlu0 %v1695_v30, %s1558_s5 }
 0x105   : > { %v492_v59 = vpop.permute.xlu1 %491  ;;  %v476_v26 = vpop.permute.xlu0 %475 }
 0x106   : > { %528 = vst.msk [vmem:[#allocation2 + $0x60] sm:$0xff] %vm515_vm4, %v492_v59  ;;  %520 = vst.msk [vmem:[#allocation2 + $0x20] sm:$0xff] %vm515_vm4, %v476_v26 }
 0x107   : > { %883 = vrot.lane.b32.xlu1 %v837_v57, %s1559_s6 }
 0x108   : > { %867 = vrot.lane.b32.xlu0 %v829_v58, %s1559_s6 }
 0x109   : > { %v781_v62 = vpop.permute.xlu1 %780  ;;  %v765_v30 = vpop.permute.xlu0 %764 }
 0x10a   : > { %818 = vst.msk [vmem:[#allocation2 + $0x58] sm:$0xff] %vm806_vm7, %v781_v62  ;;  %810 = vst.msk [vmem:[#allocation2 + $0x18] sm:$0xff] %vm806_vm7, %v765_v30 }
 0x10b   : > { %885 = vrot.lane.b32.xlu1 %v838_v60, %s1559_s6 }
 0x10c   : > { %869 = vrot.lane.b32.xlu0 %v830_v61, %s1559_s6  ;;  %s2146_s6 = scalar_lea.vmem %s2198_s3, %s1376_s30 }
 0x10d   : > { %v876_v1 = vpop.permute.xlu1 %875  ;;  %v860_v2 = vpop.permute.xlu0 %859 }
 0x10e   : > { %914 = vst.msk [vmem:[#allocation2 + $0x50] sm:$0xff] %vm903_vm8, %v876_v1  ;;  %906 = vst.msk [vmem:[#allocation2 + $0x10] sm:$0xff] %vm903_vm8, %v860_v2 }
 0x10f   : > { %980 = vrot.lane.b32.xlu1 %v934_v63, %s1560_s7 }
 0x110   : > { %964 = vrot.lane.b32.xlu0 %v926_v0, %s1560_s7 }
 0x111   : > { %v494_v7 = vpop.permute.xlu1 %493  ;;  %v478_v8 = vpop.permute.xlu0 %477 }
 0x112   : > { %529 = vst.msk [vmem:[#allocation2 + $0x68] sm:$0xff] %vm515_vm4, %v494_v7  ;;  %521 = vst.msk [vmem:[#allocation2 + $0x28] sm:$0xff] %vm515_vm4, %v478_v8 }
 0x113   : > { %982 = vrot.lane.b32.xlu1 %v935_v3, %s1560_s7 }
 0x114   : > { %966 = vrot.lane.b32.xlu0 %v927_v5, %s1560_s7 }
 0x115   : > { %v589_v9 = vpop.permute.xlu1 %588  ;;  %v573_v10 = vpop.permute.xlu0 %572 }
 0x116   : > { %625 = vst.msk [vmem:[#allocation2 + $0x60] sm:$0xff] %vm612_vm5, %v589_v9  ;;  %617 = vst.msk [vmem:[#allocation2 + $0x20] sm:$0xff] %vm612_vm5, %v573_v10 }
 0x119   : > { %v878_v11 = vpop.permute.xlu1 %877  ;;  %v862_v12 = vpop.permute.xlu0 %861 }
 0x11a   : > { %915 = vst.msk [vmem:[#allocation2 + $0x58] sm:$0xff] %vm903_vm8, %v878_v11  ;;  %907 = vst.msk [vmem:[#allocation2 + $0x18] sm:$0xff] %vm903_vm8, %v862_v12 }
 0x11d   : > { %v973_v13 = vpop.permute.xlu1 %972  ;;  %v957_v14 = vpop.permute.xlu0 %956 }
 0x11e   : > { %1011 = vst.msk [vmem:[#allocation2 + $0x50] sm:$0xff] %vm1000_vm9, %v973_v13  ;;  %1003 = vst.msk [vmem:[#allocation2 + $0x10] sm:$0xff] %vm1000_vm9, %v957_v14 }
 0x121   : > { %v302_v15 = vpop.permute.xlu1 %301  ;;  %v286_v16 = vpop.permute.xlu0 %285 }
 0x122   : > { %336 = vst.msk [vmem:[#allocation2 + $0x70] sm:$0xff] %vm321_vm2, %v302_v15  ;;  %328 = vst.msk [vmem:[#allocation2 + $0x30] sm:$0xff] %vm321_vm2, %v286_v16  ;;  %v1377_v15 = vld [vmem:[%s2197_s2] ss:$0 sm:$0xff] }
 0x125   : > { %v591_v4 = vpop.permute.xlu1 %590  ;;  %v575_v17 = vpop.permute.xlu0 %574  ;;  %v1019_v18 = vld [vmem:[#allocation2 + $0x10] sm:$0xff] }
 0x126   : > { %v1027_v19 = vld [vmem:[#allocation2 + $0x50] sm:$0xff]  ;;  %626 = vst.msk [vmem:[#allocation2 + $0x68] sm:$0xff] %vm612_vm5, %v591_v4  ;;  %618 = vst.msk [vmem:[#allocation2 + $0x28] sm:$0xff] %vm612_vm5, %v575_v17  ;;  %1431 = vmatprep.mubr.msk.f32.mxu0 %vm1045_vm10, %v1019_v18 }
 0x127   : > { %1443 = vmatprep.mubr.msk.f32.mxu1 %vm1045_vm10, %v1027_v19 }
 0x129   : > { %v686_v20 = vpop.permute.xlu1 %685  ;;  %v670_v21 = vpop.permute.xlu0 %669 }
 0x12a   : > { %722 = vst.msk [vmem:[#allocation2 + $0x60] sm:$0xff] %vm709_vm6, %v686_v20  ;;  %714 = vst.msk [vmem:[#allocation2 + $0x20] sm:$0xff] %vm709_vm6, %v670_v21 }
 0x12d   : > { %v975_v22 = vpop.permute.xlu1 %974  ;;  %v959_v23 = vpop.permute.xlu0 %958 }
 0x12e   : > { %1012 = vst.msk [vmem:[#allocation2 + $0x58] sm:$0xff] %vm1000_vm9, %v975_v22  ;;  %1004 = vst.msk [vmem:[#allocation2 + $0x18] sm:$0xff] %vm1000_vm9, %v959_v23 }
 0x131   : > { %v304_v24 = vpop.permute.xlu1 %303  ;;  %v288_v25 = vpop.permute.xlu0 %287 }
 0x132   : > { %337 = vst.msk [vmem:[#allocation2 + $0x78] sm:$0xff] %vm321_vm2, %v304_v24  ;;  %329 = vst.msk [vmem:[#allocation2 + $0x38] sm:$0xff] %vm321_vm2, %v288_v25 }
 0x135   : > { %v399_v27 = vpop.permute.xlu1 %398  ;;  %v383_v28 = vpop.permute.xlu0 %382  ;;  %v1020_v29 = vld [vmem:[#allocation2 + $0x18] sm:$0xff] }
 0x136   : > { %v1028_v31 = vld [vmem:[#allocation2 + $0x58] sm:$0xff]  ;;  %433 = vst.msk [vmem:[#allocation2 + $0x70] sm:$0xff] %vm418_vm3, %v399_v27  ;;  %425 = vst.msk [vmem:[#allocation2 + $0x30] sm:$0xff] %vm418_vm3, %v383_v28  ;;  %1432 = vmatmul.mubr.msk.f32.gmra.mxu0 %vm1045_vm10, %v1020_v29 }
 0x137   : > { %1444 = vmatmul.mubr.msk.f32.gmra.mxu1 %vm1045_vm10, %v1028_v31 }
 0x139   : > { %v688_v6 = vpop.permute.xlu1 %687  ;;  %v672_v32 = vpop.permute.xlu0 %671 }
 0x13a   : > { %723 = vst.msk [vmem:[#allocation2 + $0x68] sm:$0xff] %vm709_vm6, %v688_v6  ;;  %715 = vst.msk [vmem:[#allocation2 + $0x28] sm:$0xff] %vm709_vm6, %v672_v32 }
 0x13d   : > { %v783_v33 = vpop.permute.xlu1 %782  ;;  %v767_v34 = vpop.permute.xlu0 %766 }
 0x13e   : > { %819 = vst.msk [vmem:[#allocation2 + $0x60] sm:$0xff] %vm806_vm7, %v783_v33  ;;  %811 = vst.msk [vmem:[#allocation2 + $0x20] sm:$0xff] %vm806_vm7, %v767_v34 }
 0x141   : > { %v401_v35 = vpop.permute.xlu1 %400  ;;  %v385_v36 = vpop.permute.xlu0 %384 }
 0x142   : > { %434 = vst.msk [vmem:[#allocation2 + $0x78] sm:$0xff] %vm418_vm3, %v401_v35  ;;  %426 = vst.msk [vmem:[#allocation2 + $0x38] sm:$0xff] %vm418_vm3, %v385_v36 }
 0x145   : > { %v496_v37 = vpop.permute.xlu1 %495  ;;  %v480_v38 = vpop.permute.xlu0 %479 }
 0x146   : > { %530 = vst.msk [vmem:[#allocation2 + $0x70] sm:$0xff] %vm515_vm4, %v496_v37  ;;  %522 = vst.msk [vmem:[#allocation2 + $0x30] sm:$0xff] %vm515_vm4, %v480_v38 }
 0x149   : > { %v785_v39 = vpop.permute.xlu1 %784  ;;  %v769_v40 = vpop.permute.xlu0 %768 }
 0x14a   : > { %820 = vst.msk [vmem:[#allocation2 + $0x68] sm:$0xff] %vm806_vm7, %v785_v39  ;;  %812 = vst.msk [vmem:[#allocation2 + $0x28] sm:$0xff] %vm806_vm7, %v769_v40 }
 0x14d   : > { %v880_v41 = vpop.permute.xlu1 %879  ;;  %v864_v42 = vpop.permute.xlu0 %863 }
 0x14e   : > { %916 = vst.msk [vmem:[#allocation2 + $0x60] sm:$0xff] %vm903_vm8, %v880_v41  ;;  %908 = vst.msk [vmem:[#allocation2 + $0x20] sm:$0xff] %vm903_vm8, %v864_v42 }
 0x151   : > { %v498_v43 = vpop.permute.xlu1 %497  ;;  %v482_v44 = vpop.permute.xlu0 %481 }
 0x152   : > { %531 = vst.msk [vmem:[#allocation2 + $0x78] sm:$0xff] %vm515_vm4, %v498_v43  ;;  %523 = vst.msk [vmem:[#allocation2 + $0x38] sm:$0xff] %vm515_vm4, %v482_v44 }
 0x155   : > { %v593_v45 = vpop.permute.xlu1 %592  ;;  %v577_v46 = vpop.permute.xlu0 %576 }
 0x156   : > { %627 = vst.msk [vmem:[#allocation2 + $0x70] sm:$0xff] %vm612_vm5, %v593_v45  ;;  %619 = vst.msk [vmem:[#allocation2 + $0x30] sm:$0xff] %vm612_vm5, %v577_v46 }
 0x159   : > { %v882_v47 = vpop.permute.xlu1 %881 }
 0x15a   : > { %v866_v48 = vpop.permute.xlu0 %865  ;;  %917 = vst.msk [vmem:[#allocation2 + $0x68] sm:$0xff] %vm903_vm8, %v882_v47 }
 0x15b   : > { %909 = vst.msk [vmem:[#allocation2 + $0x28] sm:$0xff] %vm903_vm8, %v866_v48 }
 0x15d   : > { %v977_v49 = vpop.permute.xlu1 %976 }
 0x15e   : > { %v961_v50 = vpop.permute.xlu0 %960  ;;  %1013 = vst.msk [vmem:[#allocation2 + $0x60] sm:$0xff] %vm1000_vm9, %v977_v49 }
 0x15f   : > { %1005 = vst.msk [vmem:[#allocation2 + $0x20] sm:$0xff] %vm1000_vm9, %v961_v50 }
 0x161   : > { %v595_v51 = vpop.permute.xlu1 %594 }
 0x162   : > { %v579_v52 = vpop.permute.xlu0 %578  ;;  %628 = vst.msk [vmem:[#allocation2 + $0x78] sm:$0xff] %vm612_vm5, %v595_v51 }
 0x163   : > { %620 = vst.msk [vmem:[#allocation2 + $0x38] sm:$0xff] %vm612_vm5, %v579_v52 }
 0x165   : > { %v690_v53 = vpop.permute.xlu1 %689  ;;  %v1029_v56 = vld [vmem:[#allocation2 + $0x60] sm:$0xff] }
 0x166   : > { %v674_v54 = vpop.permute.xlu0 %673  ;;  %v1021_v55 = vld [vmem:[#allocation2 + $0x20] sm:$0xff]  ;;  %724 = vst.msk [vmem:[#allocation2 + $0x70] sm:$0xff] %vm709_vm6, %v690_v53  ;;  %1446 = vmatprep.mubr.msk.f32.mxu1 %vm1045_vm10, %v1029_v56 }
 0x167   : > { %716 = vst.msk [vmem:[#allocation2 + $0x30] sm:$0xff] %vm709_vm6, %v674_v54  ;;  %1434 = vmatprep.mubr.msk.f32.mxu0 %vm1045_vm10, %v1021_v55 }
 0x169   : > { %v979_v57 = vpop.permute.xlu1 %978 }
 0x16a   : > { %v963_v58 = vpop.permute.xlu0 %962  ;;  %1014 = vst.msk [vmem:[#allocation2 + $0x68] sm:$0xff] %vm1000_vm9, %v979_v57 }
 0x16b   : > { %1006 = vst.msk [vmem:[#allocation2 + $0x28] sm:$0xff] %vm1000_vm9, %v963_v58 }
 0x16d   : > { %v692_v59 = vpop.permute.xlu1 %691 }
 0x16e   : > { %v676_v26 = vpop.permute.xlu0 %675  ;;  %725 = vst.msk [vmem:[#allocation2 + $0x78] sm:$0xff] %vm709_vm6, %v692_v59 }
 0x16f   : > { %717 = vst.msk [vmem:[#allocation2 + $0x38] sm:$0xff] %vm709_vm6, %v676_v26 }
 0x171   : > { %v787_v60 = vpop.permute.xlu1 %786  ;;  %v1030_v30 = vld [vmem:[#allocation2 + $0x68] sm:$0xff] }
 0x172   : > { %v771_v61 = vpop.permute.xlu0 %770  ;;  %v1022_v62 = vld [vmem:[#allocation2 + $0x28] sm:$0xff]  ;;  %821 = vst.msk [vmem:[#allocation2 + $0x70] sm:$0xff] %vm806_vm7, %v787_v60  ;;  %1447 = vmatmul.mubr.msk.f32.gmra.mxu1 %vm1045_vm10, %v1030_v30 }
 0x173   : > { %813 = vst.msk [vmem:[#allocation2 + $0x30] sm:$0xff] %vm806_vm7, %v771_v61  ;;  %1435 = vmatmul.mubr.msk.f32.gmra.mxu0 %vm1045_vm10, %v1022_v62 }
 0x175   : > { %v789_v63 = vpop.permute.xlu1 %788 }
 0x176   : > { %v773_v0 = vpop.permute.xlu0 %772  ;;  %822 = vst.msk [vmem:[#allocation2 + $0x78] sm:$0xff] %vm806_vm7, %v789_v63 }
 0x177   : > { %814 = vst.msk [vmem:[#allocation2 + $0x38] sm:$0xff] %vm806_vm7, %v773_v0 }
 0x179   : > { %v884_v1 = vpop.permute.xlu1 %883 }
 0x17a   : > { %v868_v2 = vpop.permute.xlu0 %867  ;;  %918 = vst.msk [vmem:[#allocation2 + $0x70] sm:$0xff] %vm903_vm8, %v884_v1 }
 0x17b   : > { %910 = vst.msk [vmem:[#allocation2 + $0x30] sm:$0xff] %vm903_vm8, %v868_v2 }
 0x17d   : > { %v886_v3 = vpop.permute.xlu1 %885 }
 0x17e   : > { %v870_v5 = vpop.permute.xlu0 %869  ;;  %919 = vst.msk [vmem:[#allocation2 + $0x78] sm:$0xff] %vm903_vm8, %v886_v3 }
 0x17f   : > { %911 = vst.msk [vmem:[#allocation2 + $0x38] sm:$0xff] %vm903_vm8, %v870_v5 }
 0x181   : > { %v981_v7 = vpop.permute.xlu1 %980 }
 0x182   : > { %v965_v8 = vpop.permute.xlu0 %964  ;;  %1015 = vst.msk [vmem:[#allocation2 + $0x70] sm:$0xff] %vm1000_vm9, %v981_v7 }
 0x183   : > { %1007 = vst.msk [vmem:[#allocation2 + $0x30] sm:$0xff] %vm1000_vm9, %v965_v8 }
 0x185   : > { %v983_v9 = vpop.permute.xlu1 %982 }
 0x186   : > { %v967_v10 = vpop.permute.xlu0 %966  ;;  %1016 = vst.msk [vmem:[#allocation2 + $0x78] sm:$0xff] %vm1000_vm9, %v983_v9 }
 0x187   : > { %1008 = vst.msk [vmem:[#allocation2 + $0x38] sm:$0xff] %vm1000_vm9, %v967_v10 }
 0x189   : > { %v1031_v12 = vld [vmem:[#allocation2 + $0x70] sm:$0xff] }
 0x18a   : > { %v1023_v11 = vld [vmem:[#allocation2 + $0x30] sm:$0xff]  ;;  %1449 = vmatprep.mubr.msk.f32.mxu1 %vm1045_vm10, %v1031_v12 }
 0x18b   : > { %1437 = vmatprep.mubr.msk.f32.mxu0 %vm1045_vm10, %v1023_v11 }
 0x18d   : > { %v1032_v14 = vld [vmem:[#allocation2 + $0x78] sm:$0xff] }
 0x18e   : > { %v1024_v13 = vld [vmem:[#allocation2 + $0x38] sm:$0xff]  ;;  %1450 = vmatmul.mubr.msk.f32.gmra.mxu1 %vm1045_vm10, %v1032_v14 }
 0x18f   : > { %1438 = vmatmul.mubr.msk.f32.gmra.mxu0 %vm1045_vm10, %v1024_v13 }
 0x1b6   : > { %v1430_v16 = vpop.f32.mrf.mxu0 }
 0x1b7   : > { %v1442_v4 = vpop.f32.mrf.mxu1  ;;  %v1170_v17 = vadd.f32 %v1430_v16, %v1377_v15 }
 0x1b8   : > { %v1210_v18 = vadd.f32 %v1442_v4, %v1377_v15  ;;  %v1164_v19 = vpop.f32.mrf.mxu0 }
 0x1b9   : > { %v1204_v20 = vpop.f32.mrf.mxu1  ;;  %v1244_v21 = vmax.f32 %v1170_v17, 0.0  ;;  %v1165_v23 = vadd.f32 %v1377_v15, %v1164_v19 }
 0x1ba   : > { %v1252_v22 = vmax.f32 %v1210_v18, 0.0  ;;  %v1205_v24 = vadd.f32 %v1377_v15, %v1204_v20 }
 0x1bb   : > { %1261 = vst.msk [vmem:[%s2146_s6 + $0x8] sm:$0xff] %vm1259_vm11, %v1244_v21  ;;  %v1243_v25 = vmax.f32 %v1165_v23, 0.0 }
 0x1bc   : > { %1269 = vst.msk [vmem:[%s2146_s6 + $0x48] sm:$0xff] %vm1259_vm11, %v1252_v22  ;;  %v1251_v27 = vmax.f32 %v1205_v24, 0.0 }
 0x1bd   : > { %1260 = vst.msk [vmem:[%s2146_s6] sm:$0xff] %vm1259_vm11, %v1243_v25 }
 0x1be   : > { %1268 = vst.msk [vmem:[%s2146_s6 + $0x40] sm:$0xff] %vm1259_vm11, %v1251_v27 }
 0x1f6   : > { %v1433_v28 = vpop.f32.mrf.mxu0 }
 0x1f7   : > { %v1445_v29 = vpop.f32.mrf.mxu1  ;;  %v1180_v31 = vadd.f32 %v1433_v28, %v1377_v15 }
 0x1f8   : > { %v1220_v6 = vadd.f32 %v1445_v29, %v1377_v15  ;;  %v1174_v32 = vpop.f32.mrf.mxu0 }
 0x1f9   : > { %v1214_v33 = vpop.f32.mrf.mxu1  ;;  %v1246_v34 = vmax.f32 %v1180_v31, 0.0  ;;  %v1175_v36 = vadd.f32 %v1377_v15, %v1174_v32 }
 0x1fa   : > { %v1254_v35 = vmax.f32 %v1220_v6, 0.0  ;;  %v1215_v37 = vadd.f32 %v1377_v15, %v1214_v33 }
 0x1fb   : > { %1263 = vst.msk [vmem:[%s2146_s6 + $0x18] sm:$0xff] %vm1259_vm11, %v1246_v34  ;;  %v1245_v38 = vmax.f32 %v1175_v36, 0.0 }
 0x1fc   : > { %1271 = vst.msk [vmem:[%s2146_s6 + $0x58] sm:$0xff] %vm1259_vm11, %v1254_v35  ;;  %v1253_v39 = vmax.f32 %v1215_v37, 0.0 }
 0x1fd   : > { %1262 = vst.msk [vmem:[%s2146_s6 + $0x10] sm:$0xff] %vm1259_vm11, %v1245_v38 }
 0x1fe   : > { %1270 = vst.msk [vmem:[%s2146_s6 + $0x50] sm:$0xff] %vm1259_vm11, %v1253_v39 }
 0x232   : > { %v1448_v41 = vpop.f32.mrf.mxu1 }
 0x233   : > { %v1436_v40 = vpop.f32.mrf.mxu0  ;;  %v1230_v43 = vadd.f32 %v1448_v41, %v1377_v15 }
 0x234   : > { %v1190_v42 = vadd.f32 %v1436_v40, %v1377_v15  ;;  %v1224_v45 = vpop.f32.mrf.mxu1 }
 0x235   : > { %v1184_v44 = vpop.f32.mrf.mxu0  ;;  %v1256_v47 = vmax.f32 %v1230_v43, 0.0  ;;  %v1225_v49 = vadd.f32 %v1377_v15, %v1224_v45 }
 0x236   : > { %v1248_v46 = vmax.f32 %v1190_v42, 0.0  ;;  %v1185_v48 = vadd.f32 %v1377_v15, %v1184_v44 }
 0x237   : > { %1273 = vst.msk [vmem:[%s2146_s6 + $0x68] sm:$0xff] %vm1259_vm11, %v1256_v47  ;;  %v1255_v51 = vmax.f32 %v1225_v49, 0.0 }
 0x238   : > { %1265 = vst.msk [vmem:[%s2146_s6 + $0x28] sm:$0xff] %vm1259_vm11, %v1248_v46  ;;  %v1247_v50 = vmax.f32 %v1185_v48, 0.0 }
 0x239   : > { %1272 = vst.msk [vmem:[%s2146_s6 + $0x60] sm:$0xff] %vm1259_vm11, %v1255_v51 }
 0x23a   : > { %1264 = vst.msk [vmem:[%s2146_s6 + $0x20] sm:$0xff] %vm1259_vm11, %v1247_v50 }
 0x24e   : > { %v1451_v53 = vpop.f32.mrf.mxu1 }
 0x24f   : > { %v1439_v52 = vpop.f32.mrf.mxu0  ;;  %v1240_v55 = vadd.f32 %v1451_v53, %v1377_v15 }
 0x250   : > { %v1200_v54 = vadd.f32 %v1439_v52, %v1377_v15  ;;  %v1234_v57 = vpop.f32.mrf.mxu1 }
 0x251   : > { %v1194_v56 = vpop.f32.mrf.mxu0  ;;  %v1258_v59 = vmax.f32 %v1240_v55, 0.0  ;;  %v1235_v60 = vadd.f32 %v1377_v15, %v1234_v57 }
 0x252   : > { %v1250_v58 = vmax.f32 %v1200_v54, 0.0  ;;  %v1195_v26 = vadd.f32 %v1377_v15, %v1194_v56 }
 0x253   : > { %1275 = vst.msk [vmem:[%s2146_s6 + $0x78] sm:$0xff] %vm1259_vm11, %v1258_v59  ;;  %v1257_v62 = vmax.f32 %v1235_v60, 0.0 }
 0x254   : > { %1267 = vst.msk [vmem:[%s2146_s6 + $0x38] sm:$0xff] %vm1259_vm11, %v1250_v58  ;;  %v1249_v61 = vmax.f32 %v1195_v26, 0.0 }
 0x255   : > { %1274 = vst.msk [vmem:[%s2146_s6 + $0x70] sm:$0xff] %vm1259_vm11, %v1257_v62 }
 0x256   : > { %1266 = vst.msk [vmem:[%s2146_s6 + $0x30] sm:$0xff] %vm1259_vm11, %v1249_v61 }
 0x257 PF: > { %s13_s16 = sadd.s32 1, %s1551_s16   ;;  %s2199_s12 = smov %s1543_s14 }
 0x258   : > { %p10_p8 = scmp.ge.s32.totalorder %s13_s16, 8   ;;  %s2200_s13 = smov %s1547_s15 }
 0x259   : > { %s2201_s14 = smov %s2204_s17  ;;  %s2202_s15 = smov %s2208_s18 }
 0x25a   :  { %12 = sbr.rel (!%p10_p8) target bundleno = 3 (0x3), region = 62 }

</bundles_post_ra>
